<compile_context>
chip_gen: v7x
topology: tpu7x:2x2x1
jax: 0.10.0
libtpu: 0.0.40
codegen_flags: <defaults>
</compile_context>

<pallas_src>
import math
import numpy as np

import jax
import jax.numpy as jnp
from jax.experimental import pallas as pl
from jax.experimental.pallas import tpu as pltpu


def _gaussian_1d(window_size: int, sigma: float) -> np.ndarray:
    g = np.array(
        [math.exp(-((x - window_size // 2) ** 2) / float(2 * sigma ** 2))
         for x in range(window_size)],
        dtype=np.float64,
    )
    return (g / g.sum()).astype(np.float32)


def _channels_per_block(nc: int, h: int, h8: int, w: int,
                        max_b: int = 8,
                        max_gv_bytes: int = 4 << 20,
                        max_img_bytes: int = 8 << 20) -> int:
    """Largest divisor of nc (<= max_b) whose block fits the VMEM budget and,
    when possible, still leaves >= 2 grid steps for megacore parallelism."""
    ok = []
    for b in range(1, min(nc, max_b) + 1):
        if nc % b:
            continue
        gv_bytes = (b * h) * (b * h8) * 4
        img_bytes = 2 * (b * h8) * w * 4          # x and y blocks
        if gv_bytes <= max_gv_bytes and img_bytes <= max_img_bytes:
            ok.append(b)
    if not ok:
        return 1
    multi_step = [b for b in ok if nc // b >= 2]
    return max(multi_step) if multi_step else max(ok)


def ssim_loss(img1: jax.Array, img2: jax.Array, window_size: int = 11) -> jax.Array:
    """Equivalent to SSIM(window_size)(img1, img2) from the PyTorch module."""
    assert img1.shape == img2.shape and img1.ndim == 4
    N, C, H, W = img1.shape
    NC = N * C
    K = window_size
    P = K // 2
    H8 = ((H + 7) // 8) * 8                 # sublane-aligned rows per channel

    g = _gaussian_1d(K, 1.5)
    C1 = 0.01 ** 2
    C2 = 0.03 ** 2

    B = _channels_per_block(NC, H, H8, W)   # channels fused per grid step
    G = NC // B                             # grid size (>= 2 when possible)

    # ---- layout glue (reshape only; row pad only if H is not 8-aligned) ----
    x = img1.astype(jnp.float32).reshape(NC, H, W)
    y = img2.astype(jnp.float32).reshape(NC, H, W)
    if H8 != H:
        x = jnp.pad(x, ((0, 0), (0, H8 - H), (0, 0)))
        y = jnp.pad(y, ((0, 0), (0, H8 - H), (0, 0)))
    x = x.reshape(NC * H8, W)               # channels stacked along rows
    y = y.reshape(NC * H8, W)

    # ---- compile-time band matrices (zero-padded separable Gaussian) -------
    # Vertical pass:  out[h] = sum_k g[k] * img[h + k - P]  (zeros outside).
    gv = np.zeros((H, H8), dtype=np.float32)
    for h in range(H):
        for k in range(K):
            j = h + k - P
            if 0 <= j < H:
                gv[h, j] += g[k]
    gv_blk = jnp.asarray(np.kron(np.eye(B, dtype=np.float32), gv))  # (B*H, B*H8)

    # Horizontal pass: out[:, w] = sum_k g[k] * t[:, w + k - P].
    gh = np.zeros((W, W), dtype=np.float32)
    for w in range(W):
        for k in range(K):
            i = w + k - P
            if 0 <= i < W:
                gh[i, w] += g[k]
    gh = jnp.asarray(gh)                                             # (W, W)

    def ssim_kernel(x_ref, y_ref, gv_ref, gh_ref, out_ref):
        xb = x_ref[...]                                  # (B*H8, W)
        yb = y_ref[...]
        gvb = gv_ref[...]                                # (B*H, B*H8)
        ghb = gh_ref[...]                                # (W, W)

        def blur(p):
            t = jnp.dot(gvb, p, preferred_element_type=jnp.float32)   # (B*H, W)
            return jnp.dot(t, ghb, preferred_element_type=jnp.float32)

        mu1 = blur(xb)
        mu2 = blur(yb)
        e_xx = blur(xb * xb)
        e_yy = blur(yb * yb)
        e_xy = blur(xb * yb)

        mu1_sq = mu1 * mu1
        mu2_sq = mu2 * mu2
        mu1_mu2 = mu1 * mu2
        sigma1_sq = e_xx - mu1_sq
        sigma2_sq = e_yy - mu2_sq
        sigma12 = e_xy - mu1_mu2

        num = (2.0 * mu1_mu2 + C1) * (2.0 * sigma12 + C2)
        den = (mu1_sq + mu2_sq + C1) * (sigma1_sq + sigma2_sq + C2)
        # approx=False keeps exact agreement with the f32 reference.
        ssim_map = num * pl.reciprocal(den, approx=False)

        # Per-grid-step partial sum (kept as a (1,1) vector; no scalar extract).
        out_ref[0] = jnp.sum(ssim_map, keepdims=True)

    partial_sums = pl.pallas_call(
        ssim_kernel,
        out_shape=jax.ShapeDtypeStruct((G, 1, 1), jnp.float32),
        grid=(G,),
        in_specs=[
            pl.BlockSpec((B * H8, W), lambda i: (i, 0)),
            pl.BlockSpec((B * H8, W), lambda i: (i, 0)),
            pl.BlockSpec((B * H, B * H8), lambda i: (0, 0)),
            pl.BlockSpec((W, W), lambda i: (0, 0)),
        ],
        out_specs=pl.BlockSpec((1, 1, 1), lambda i: (i, 0, 0)),
        compiler_params=pltpu.CompilerParams(
            dimension_semantics=("parallel",),
            vmem_limit_bytes=32 * 1024 * 1024,
        ),
    )(x, y, gv_blk, gh)

    mean_ssim = jnp.sum(partial_sums) / float(N * C * H * W)
    return (1.0 - mean_ssim).astype(jnp.float32)


if __name__ == "__main__":
    key = jax.random.PRNGKey(0)
    k1, k2 = jax.random.split(key)
    # Small shapes consistent with the module: NCHW, batch=2, channels=4, 16x16.
    img1 = jax.random.uniform(k1, (2, 4, 16, 16), dtype=jnp.float32)
    img2 = jax.random.uniform(k2, (2, 4, 16, 16), dtype=jnp.float32)

    loss = ssim_loss(img1, img2, window_size=11)
    jax.block_until_ready(loss)
    print("KERNEL_OK")
</pallas_src>

<mosaic_0001>
module attributes {stable_mosaic.version = 11 : i64} {
  func.func @ssim_kernel(%arg0: i32, %arg1: memref<64x16xf32, #tpu.memory_space<vmem>>, %arg2: memref<64x16xf32, #tpu.memory_space<vmem>>, %arg3: memref<64x64xf32, #tpu.memory_space<vmem>>, %arg4: memref<16x16xf32, #tpu.memory_space<vmem>>, %arg5: memref<1x1x1xf32, #tpu.memory_space<vmem>>) attributes {dimension_semantics = [#tpu.dimension_semantics<parallel>], iteration_bounds = array<i64: 2>, scalar_prefetch = 0 : i64, scratch_operands = 0 : i64, tpu.core_type = #tpu.core_type<tc>, window_params = [{transform_indices = @transform_0, window_bounds = array<i64: 64, 16>}, {transform_indices = @transform_1, window_bounds = array<i64: 64, 16>}, {pipeline_mode = #tpu.pipeline_mode<synchronous>, transform_indices = @transform_2, window_bounds = array<i64: 64, 64>}, {pipeline_mode = #tpu.pipeline_mode<synchronous>, transform_indices = @transform_3, window_bounds = array<i64: 16, 16>}, {transform_indices = @transform_4, window_bounds = array<i64: 1, 1, 1>}]} {
    %c0 = arith.constant 0 : index
    %c0_0 = arith.constant 0 : index
    %0 = vector.load %arg1[%c0, %c0_0] : memref<64x16xf32, #tpu.memory_space<vmem>>, vector<64x16xf32>
    %c0_1 = arith.constant 0 : index
    %c0_2 = arith.constant 0 : index
    %1 = vector.load %arg2[%c0_1, %c0_2] : memref<64x16xf32, #tpu.memory_space<vmem>>, vector<64x16xf32>
    %c0_3 = arith.constant 0 : index
    %c0_4 = arith.constant 0 : index
    %2 = vector.load %arg3[%c0_3, %c0_4] : memref<64x64xf32, #tpu.memory_space<vmem>>, vector<64x64xf32>
    %c0_5 = arith.constant 0 : index
    %c0_6 = arith.constant 0 : index
    %3 = vector.load %arg4[%c0_5, %c0_6] : memref<16x16xf32, #tpu.memory_space<vmem>>, vector<16x16xf32>
    %cst = arith.constant dense<0.000000e+00> : vector<64x16xf32>
    %4 = tpu.matmul %2, %0, %cst {dimension_numbers = #tpu.dot_dimension_numbers<[1], [0], [0], [1], [0, 0, 1, 1], [], []>} : vector<64x64xf32>, vector<64x16xf32>, vector<64x16xf32> -> vector<64x16xf32>
    %cst_7 = arith.constant dense<0.000000e+00> : vector<64x16xf32>
    %5 = tpu.matmul %4, %3, %cst_7 {dimension_numbers = #tpu.dot_dimension_numbers<[1], [0], [0], [1], [0, 0, 1, 1], [], []>} : vector<64x16xf32>, vector<16x16xf32>, vector<64x16xf32> -> vector<64x16xf32>
    %cst_8 = arith.constant dense<0.000000e+00> : vector<64x16xf32>
    %6 = tpu.matmul %2, %1, %cst_8 {dimension_numbers = #tpu.dot_dimension_numbers<[1], [0], [0], [1], [0, 0, 1, 1], [], []>} : vector<64x64xf32>, vector<64x16xf32>, vector<64x16xf32> -> vector<64x16xf32>
    %cst_9 = arith.constant dense<0.000000e+00> : vector<64x16xf32>
    %7 = tpu.matmul %6, %3, %cst_9 {dimension_numbers = #tpu.dot_dimension_numbers<[1], [0], [0], [1], [0, 0, 1, 1], [], []>} : vector<64x16xf32>, vector<16x16xf32>, vector<64x16xf32> -> vector<64x16xf32>
    %8 = arith.mulf %0, %0 : vector<64x16xf32>
    %cst_10 = arith.constant dense<0.000000e+00> : vector<64x16xf32>
    %9 = tpu.matmul %2, %8, %cst_10 {dimension_numbers = #tpu.dot_dimension_numbers<[1], [0], [0], [1], [0, 0, 1, 1], [], []>} : vector<64x64xf32>, vector<64x16xf32>, vector<64x16xf32> -> vector<64x16xf32>
    %cst_11 = arith.constant dense<0.000000e+00> : vector<64x16xf32>
    %10 = tpu.matmul %9, %3, %cst_11 {dimension_numbers = #tpu.dot_dimension_numbers<[1], [0], [0], [1], [0, 0, 1, 1], [], []>} : vector<64x16xf32>, vector<16x16xf32>, vector<64x16xf32> -> vector<64x16xf32>
    %11 = arith.mulf %1, %1 : vector<64x16xf32>
    %cst_12 = arith.constant dense<0.000000e+00> : vector<64x16xf32>
    %12 = tpu.matmul %2, %11, %cst_12 {dimension_numbers = #tpu.dot_dimension_numbers<[1], [0], [0], [1], [0, 0, 1, 1], [], []>} : vector<64x64xf32>, vector<64x16xf32>, vector<64x16xf32> -> vector<64x16xf32>
    %cst_13 = arith.constant dense<0.000000e+00> : vector<64x16xf32>
    %13 = tpu.matmul %12, %3, %cst_13 {dimension_numbers = #tpu.dot_dimension_numbers<[1], [0], [0], [1], [0, 0, 1, 1], [], []>} : vector<64x16xf32>, vector<16x16xf32>, vector<64x16xf32> -> vector<64x16xf32>
    %14 = arith.mulf %0, %1 : vector<64x16xf32>
    %cst_14 = arith.constant dense<0.000000e+00> : vector<64x16xf32>
    %15 = tpu.matmul %2, %14, %cst_14 {dimension_numbers = #tpu.dot_dimension_numbers<[1], [0], [0], [1], [0, 0, 1, 1], [], []>} : vector<64x64xf32>, vector<64x16xf32>, vector<64x16xf32> -> vector<64x16xf32>
    %cst_15 = arith.constant dense<0.000000e+00> : vector<64x16xf32>
    %16 = tpu.matmul %15, %3, %cst_15 {dimension_numbers = #tpu.dot_dimension_numbers<[1], [0], [0], [1], [0, 0, 1, 1], [], []>} : vector<64x16xf32>, vector<16x16xf32>, vector<64x16xf32> -> vector<64x16xf32>
    %17 = arith.mulf %5, %5 : vector<64x16xf32>
    %18 = arith.mulf %7, %7 : vector<64x16xf32>
    %19 = arith.mulf %5, %7 : vector<64x16xf32>
    %20 = arith.subf %10, %17 : vector<64x16xf32>
    %21 = arith.subf %13, %18 : vector<64x16xf32>
    %22 = arith.subf %16, %19 : vector<64x16xf32>
    %cst_16 = arith.constant 2.000000e+00 : f32
    %23 = vector.broadcast %cst_16 : f32 to vector<64x16xf32>
    %24 = arith.mulf %23, %19 : vector<64x16xf32>
    %cst_17 = arith.constant 9.99999974E-5 : f32
    %25 = vector.broadcast %cst_17 : f32 to vector<64x16xf32>
    %26 = arith.addf %24, %25 : vector<64x16xf32>
    %cst_18 = arith.constant 2.000000e+00 : f32
    %27 = vector.broadcast %cst_18 : f32 to vector<64x16xf32>
    %28 = arith.mulf %27, %22 : vector<64x16xf32>
    %cst_19 = arith.constant 8.99999984E-4 : f32
    %29 = vector.broadcast %cst_19 : f32 to vector<64x16xf32>
    %30 = arith.addf %28, %29 : vector<64x16xf32>
    %31 = arith.mulf %26, %30 : vector<64x16xf32>
    %32 = arith.addf %17, %18 : vector<64x16xf32>
    %cst_20 = arith.constant 9.99999974E-5 : f32
    %33 = vector.broadcast %cst_20 : f32 to vector<64x16xf32>
    %34 = arith.addf %32, %33 : vector<64x16xf32>
    %35 = arith.addf %20, %21 : vector<64x16xf32>
    %cst_21 = arith.constant 8.99999984E-4 : f32
    %36 = vector.broadcast %cst_21 : f32 to vector<64x16xf32>
    %37 = arith.addf %35, %36 : vector<64x16xf32>
    %38 = arith.mulf %34, %37 : vector<64x16xf32>
    %39 = tpu.reciprocal %38 : vector<64x16xf32> -> vector<64x16xf32>
    %40 = arith.mulf %31, %39 : vector<64x16xf32>
    %41 = vector.shape_cast %40 : vector<64x16xf32> to vector<1x64x16xf32>
    %cst_22 = arith.constant dense<0.000000e+00> : vector<1xf32>
    %42 = vector.multi_reduction <add>, %41, %cst_22 [1, 2] : vector<1x64x16xf32> to vector<1xf32>
    %43 = vector.shape_cast %42 : vector<1xf32> to vector<1x1x1xf32>
    %44 = vector.extract %43[0, 0, 0] : f32 from vector<1x1x1xf32>
    %45 = vector.broadcast %44 : f32 to vector<1x1xf32>
    %c0_23 = arith.constant 0 : index
    %c0_24 = arith.constant 0 : index
    %c0_25 = arith.constant 0 : index
    %46 = vector.load %arg5[%c0_23, %c0_24, %c0_25] : memref<1x1x1xf32, #tpu.memory_space<vmem>>, vector<1x1x1xf32>
    %47 = vector.shape_cast %46 : vector<1x1x1xf32> to vector<1x1xf32>
    %48 = vector.shape_cast %45 : vector<1x1xf32> to vector<1x1x1xf32>
    tpu.vector_store %arg5[%c0_23, %c0_24, %c0_25], %48 {strides = array<i32>} : memref<1x1x1xf32, #tpu.memory_space<vmem>>, vector<1x1x1xf32>,
    return
  }
  func.func @transform_0(%arg0: i32) -> (i32, i32) {
    %c0_i32 = arith.constant 0 : i32
    %c0_i32_0 = arith.constant 0 : i32
    return %arg0, %c0_i32 : i32, i32
  }
  func.func @transform_1(%arg0: i32) -> (i32, i32) {
    %c0_i32 = arith.constant 0 : i32
    %c0_i32_0 = arith.constant 0 : i32
    return %arg0, %c0_i32 : i32, i32
  }
  func.func @transform_2(%arg0: i32) -> (i32, i32) {
    %c0_i32 = arith.constant 0 : i32
    %c0_i32_0 = arith.constant 0 : i32
    %c0_i32_1 = arith.constant 0 : i32
    return %c0_i32, %c0_i32_0 : i32, i32
  }
  func.func @transform_3(%arg0: i32) -> (i32, i32) {
    %c0_i32 = arith.constant 0 : i32
    %c0_i32_0 = arith.constant 0 : i32
    %c0_i32_1 = arith.constant 0 : i32
    return %c0_i32, %c0_i32_0 : i32, i32
  }
  func.func @transform_4(%arg0: i32) -> (i32, i32, i32) {
    %c0_i32 = arith.constant 0 : i32
    %c0_i32_0 = arith.constant 0 : i32
    %c0_i32_1 = arith.constant 0 : i32
    return %arg0, %c0_i32, %c0_i32_0 : i32, i32, i32
  }
}

</mosaic_0001>

<bundles_post_ra>
// kernel: tpu_custom_call.1
= control target key start
LH: loop header
LB: loop body
LE: loop exit
PB: predicated region body
PF: predicated region fallthrough
CT: control target
= control target key end

     0   :  { %s2296_s15 = smov 0   ;;  %s2706_s0 = inlined_call_operand.vmem [shape: f32[128,16], index: 0, kind: input, shape index: {}]   ;;  %s2707_s1 = inlined_call_operand.vmem [shape: f32[128,16], index: 1, kind: input, shape index: {}]   ;;  %s2708_s2 = inlined_call_operand.vmem [shape: f32[64,64], index: 2, kind: input, shape index: {}]   ;;  %s2709_s3 = inlined_call_operand.vmem [shape: f32[16,16], index: 3, kind: input, shape index: {}]   ;;  %s2710_s4 = inlined_call_operand.vmem [shape: f32[2,1,1], index: 4, kind: output, shape index: {}]  }
   0x1 LB: > { %s2302_s16 = sadd.s32 4294967295, %s2269_s15   ;;  %p1698_p0 = scmp.ge.s32.totalorder %s2269_s15, 1  ;;  %s2269_s15 = sphi %s2296_s15, %s14_s15  }
   0x2   : > { %p174_p1 = scmp.lt.s32.totalorder %s2269_s15, 3 }
   0x4   : > { %p175_p2 = pnand %p1698_p0, %p174_p1 }
   0x5   : > { %s1699_s17 = sshll.u32 (!%p175_p2), %s2302_s16, 3  ;;  %v2310_v0 = vld [vmem:[%s2708_s2] sm:$0xff] (!%p175_p2)  ;;  %vm244_vm0 = vcmask (!%p175_p2), 523264   ;;  %v243_v2 = vld [vmem:[%s2709_s3 + $0x8] sm:$0xff] (!%p175_p2)  ;;  %v2364_v17 = vld [vmem:[%s2708_s2 + $0x10] sm:$0xff] (!%p175_p2)  ;;  %vm374_vm1 = vcmask (!%p175_p2), 130048  }
   0x6   : > { %178 = sbr.rel (%p175_p2) target bundleno = 973 (0x3cd), region = 36  ;;  %p204_p3 = scmp.lt.s32.totalorder (!%p175_p2), %s1699_s17, 15  ;;  %1931 = vmatprep.mubr.msk.f32.mxu0 (!%p175_p2), %vm244_vm0, %v2310_v0  ;;  %v242_v1 = vld [vmem:[%s2709_s3] sm:$0xff] (!%p175_p2)  ;;  %v2359_v16 = vld [vmem:[%s2708_s2 + $0x8] sm:$0xff] (!%p175_p2)  ;;  %v2374_v18 = vld [vmem:[%s2708_s2 + $0x18] sm:$0xff] (!%p175_p2)  ;;  %vm1633_vm2 = vcmask (!%p175_p2), 0  }
   0x7   : > { %v2322_v3 = vpack.c.bf16 (!%p175_p2), %v243_v2, %v242_v1  ;;  %v2380_v19 = vld [vmem:[%s2708_s2 + $0x20] sm:$0xff] (!%p175_p2)  ;;  %v2390_v20 = vld [vmem:[%s2708_s2 + $0x28] sm:$0xff] (!%p175_p2)  ;;  %v2395_v21 = vld [vmem:[%s2708_s2 + $0x30] sm:$0xff] (!%p175_p2)  ;;  %p215_p4 = scmp.lt.s32.totalorder (!%p175_p2), %s2302_s16, 1 }
   0x8   : > { %v2404_v22 = vld [vmem:[%s2708_s2 + $0x38] sm:$0xff] (!%p175_p2) }
   0x9   : > { %2152 = vmatprep.subr.bf16.mxu1 (!%p175_p2), %v2322_v3 }
   0xa   : > { %2154 = vmatpush3.bf16.msra.mxu1 (!%p175_p2), %v2322_v3 }
   0xd   : > { %s2712_s17 = smov (!%p204_p3, %s1699_s17), 15  ;;  %s2714_s16 = smov (!%p215_p4, %s2302_s16), 1 }
   0xe   : > { %s1700_s24 = sshll.u32 %s2712_s17, 3  ;;  %s217_s23 = scalar_lea.vmem %s2710_s4, %s2714_s16 }
   0xf   : > { %s207_s27 = scalar_lea.vmem %s2706_s0, %s1700_s24  ;;  %s213_s21 = scalar_lea.vmem %s2707_s1, %s1700_s24 }
  0x10   : > { %v2331_v4 = vld [vmem:[%s207_s27] sm:$0xff]  ;;  %v2333_v5 = vld [vmem:[%s207_s27 + $0x8] sm:$0xff]  ;;  %v2335_v6 = vld [vmem:[%s207_s27 + $0x10] sm:$0xff] }
  0x11   : > { %v2135_v7 = vpack.c.bf16 %v2333_v5, %v2331_v4  ;;  %v2340_v8 = vld [vmem:[%s207_s27 + $0x18] sm:$0xff]  ;;  %v2344_v10 = vld [vmem:[%s207_s27 + $0x20] sm:$0xff]  ;;  %v2346_v11 = vld [vmem:[%s207_s27 + $0x28] sm:$0xff]  ;;  %v738_v47 = vmul.f32 %v2331_v4, %v2331_v4  ;;  %v739_v48 = vmul.f32 %v2333_v5, %v2333_v5  ;;  %v740_v52 = vmul.f32 %v2335_v6, %v2335_v6 }
  0x12   : > { %v2139_v9 = vpack.c.bf16 %v2340_v8, %v2335_v6  ;;  %v2143_v12 = vpack.c.bf16 %v2346_v11, %v2344_v10  ;;  %v2350_v13 = vld [vmem:[%s207_s27 + $0x30] sm:$0xff]  ;;  %v2352_v14 = vld [vmem:[%s207_s27 + $0x38] sm:$0xff]  ;;  %v226_v23 = vld [vmem:[%s213_s21] sm:$0xff]  ;;  %v741_v53 = vmul.f32 %v2340_v8, %v2340_v8  ;;  %v742_v55 = vmul.f32 %v2344_v10, %v2344_v10 }
  0x13   : > { %2136 = vmatprep.subr.bf16.mxu0 %v2135_v7  ;;  %v2147_v15 = vpack.c.bf16 %v2352_v14, %v2350_v13  ;;  %v227_v24 = vld [vmem:[%s213_s21 + $0x8] sm:$0xff]  ;;  %v980_v26 = vmul.f32 %v226_v23, %v226_v23  ;;  %v1222_v29 = vmul.f32 %v226_v23, %v2331_v4  ;;  %v2419_v32 = vld [vmem:[%s213_s21 + $0x10] sm:$0xff]  ;;  %v2421_v33 = vld [vmem:[%s213_s21 + $0x18] sm:$0xff]  ;;  %v2175_v51 = vpack.c.bf16 %v739_v48, %v738_v47 }
  0x14   : > { %2138 = vmatpush3.bf16.msra.mxu0 %v2135_v7  ;;  %v2155_v25 = vpack.c.bf16 %v227_v24, %v226_v23  ;;  %v981_v27 = vmul.f32 %v227_v24, %v227_v24  ;;  %v1223_v30 = vmul.f32 %v227_v24, %v2333_v5  ;;  %v2159_v36 = vpack.c.bf16 %v2421_v33, %v2419_v32  ;;  %v2426_v37 = vld [vmem:[%s213_s21 + $0x20] sm:$0xff]  ;;  %v2428_v38 = vld [vmem:[%s213_s21 + $0x28] sm:$0xff]  ;;  %v2434_v42 = vld [vmem:[%s213_s21 + $0x30] sm:$0xff] }
  0x15   : > { %2140 = vmatprep.subr.bf16.mxu0 %v2139_v9  ;;  %v2163_v41 = vpack.c.bf16 %v2428_v38, %v2426_v37  ;;  %v2436_v43 = vld [vmem:[%s213_s21 + $0x38] sm:$0xff]  ;;  %v2179_v54 = vpack.c.bf16 %v741_v53, %v740_v52  ;;  %v743_v56 = vmul.f32 %v2346_v11, %v2346_v11  ;;  %v744_v58 = vmul.f32 %v2350_v13, %v2350_v13 }
  0x16   : > { %2156 = vmatprep.subr.bf16.mxu1 %v2155_v25  ;;  %v2413_v28 = vpack.c.bf16 %v981_v27, %v980_v26  ;;  %v2417_v31 = vpack.c.bf16 %v1223_v30, %v1222_v29  ;;  %v2167_v46 = vpack.c.bf16 %v2436_v43, %v2434_v42  ;;  %v745_v59 = vmul.f32 %v2352_v14, %v2352_v14 }
  0x17   : > { %v2183_v57 = vpack.c.bf16 %v743_v56, %v742_v55  ;;  %v982_v61 = vmul.f32 %v2419_v32, %v2419_v32  ;;  %v983_v62 = vmul.f32 %v2421_v33, %v2421_v33  ;;  %v984_v1 = vmul.f32 %v2426_v37, %v2426_v37 }
  0x18   : > { %2142 = vmatpush3.bf16.msra.mxu0 %v2139_v9  ;;  %v2187_v60 = vpack.c.bf16 %v745_v59, %v744_v58  ;;  %v985_v2 = vmul.f32 %v2428_v38, %v2428_v38  ;;  %v986_v5 = vmul.f32 %v2434_v42, %v2434_v42  ;;  %v987_v7 = vmul.f32 %v2436_v43, %v2436_v43 }
  0x19   : > { %2144 = vmatprep.subr.bf16.mxu0 %v2143_v12  ;;  %v2199_v63 = vpack.c.bf16 %v983_v62, %v982_v61  ;;  %v1226_v24 = vmul.f32 %v2426_v37, %v2344_v10  ;;  %v1229_v26 = vmul.f32 %v2436_v43, %v2352_v14 }
  0x1a   : > { %v2203_v4 = vpack.c.bf16 %v985_v2, %v984_v1  ;;  %v2207_v9 = vpack.c.bf16 %v987_v7, %v986_v5 }
  0x1c   : > { %2146 = vmatpush3.bf16.msra.mxu0 %v2143_v12  ;;  %v1224_v12 = vmul.f32 %v2419_v32, %v2335_v6 }
  0x1d   : > { %2148 = vmatprep.subr.bf16.mxu0 %v2147_v15 }
  0x20   : > { %2150 = vmatpush3.bf16.msra.mxu0 %v2147_v15  ;;  %v1225_v15 = vmul.f32 %v2421_v33, %v2340_v8  ;;  %v1228_v8 = vmul.f32 %v2434_v42, %v2350_v13 }
  0x21   : > { %2172 = vmatprep.subr.bf16.mxu0 %v2322_v3 }
  0x22   : > { %v2219_v23 = vpack.c.bf16 %v1225_v15, %v1224_v12  ;;  %v2227_v10 = vpack.c.bf16 %v1229_v26, %v1228_v8 }
  0x23   : > { %1932 = vmatmul.mubr.msk.f32.vlgmr.msra.gmra.mrb[0].mxu0 %vm244_vm0, %v2359_v16 }
  0x24   : > { %1934 = vmatprep.mubr.msk.f32.mxu0 %vm244_vm0, %v2364_v17  ;;  %2174 = vmatpush3.bf16.msra.mxu0 %v2322_v3 }
  0x25   : > { %2192 = vmatprep.subr.bf16.mxu0 %v2322_v3 }
  0x27   : > { %1935 = vmatmul.mubr.msk.f32.gmra.mrb[2].mxu0 %vm244_vm0, %v2374_v18 }
  0x28   : > { %1937 = vmatprep.mubr.msk.f32.mxu0 %vm244_vm0, %v2380_v19 }
  0x2b   : > { %1938 = vmatmul.mubr.msk.f32.gmra.mrb[4].mxu0 %vm244_vm0, %v2390_v20 }
  0x2c   : > { %1940 = vmatprep.mubr.msk.f32.mxu0 %vm244_vm0, %v2395_v21 }
  0x2f   : > { %1941 = vmatmul.mubr.msk.f32.gmra.mrb[6].mxu0 %vm244_vm0, %v2404_v22 }
  0xf6   : > { %v1933_v34 = vpop.f32.mrb[0].mxu0 }
  0xf7   : > { %v335_v35 = vpop.f32.mrb[1].mxu0 }
  0xf8   : > { %1947 = vmatprep.mubr.msk.f32.mxu1 %vm374_vm1, %v335_v35 }
  0xf9   : > { %1948 = vmatmul.mubr.msk.f32.vlgmr.msra.gmra.mrb[0].mxu1 %vm374_vm1, %v1933_v34 }
  0xfa   : > { %2158 = vmatpush3.bf16.msra.mxu1 %v2155_v25  ;;  %v1936_v39 = vpop.f32.mrb[2].mxu0  ;;  %v1227_v25 = vmul.f32 %v2428_v38, %v2346_v11 }
  0xfb   : > { %v345_v40 = vpop.f32.mrb[3].mxu0  ;;  %2160 = vmatprep.subr.bf16.mxu1 %v2159_v36 }
  0xfc   : > { %1950 = vmatprep.mubr.msk.f32.mxu1 %vm374_vm1, %v345_v40  ;;  %v2223_v6 = vpack.c.bf16 %v1227_v25, %v1226_v24 }
  0xfd   : > { %1951 = vmatmul.mubr.msk.f32.gmra.mrb[2].mxu1 %vm374_vm1, %v1936_v39 }
  0xfe   : > { %2162 = vmatpush3.bf16.msra.mxu1 %v2159_v36  ;;  %v1939_v44 = vpop.f32.mrb[4].mxu0 }
  0xff   : > { %v355_v45 = vpop.f32.mrb[5].mxu0  ;;  %2164 = vmatprep.subr.bf16.mxu1 %v2163_v41 }
 0x100   : > { %1953 = vmatprep.mubr.msk.f32.mxu1 %vm374_vm1, %v355_v45 }
 0x101   : > { %1954 = vmatmul.mubr.msk.f32.gmra.mrb[4].mxu1 %vm374_vm1, %v1939_v44 }
 0x102   : > { %2166 = vmatpush3.bf16.msra.mxu1 %v2163_v41  ;;  %v1942_v49 = vpop.f32.mrb[6].mxu0 }
 0x103   : > { %v365_v50 = vpop.f32.mrb[7].mxu0  ;;  %2168 = vmatprep.subr.bf16.mxu1 %v2167_v46 }
 0x104   : > { %1956 = vmatprep.mubr.msk.f32.mxu1 %vm374_vm1, %v365_v50 }
 0x105   : > { %1957 = vmatmul.mubr.msk.f32.gmra.mrb[6].mxu1 %vm374_vm1, %v1942_v49 }
 0x106   : > { %2170 = vmatpush3.bf16.msra.mxu1 %v2167_v46  ;;  %1975 = vmatprep.mubr.msk.f32.mxu1 %vm244_vm0, %v2310_v0 }
 0x107   : > { %2176 = vmatprep.subr.bf16.mxu1 %v2175_v51 }
 0x109   : > { %1976 = vmatmul.mubr.msk.f32.vlgmr.msra.gmra.mrb[8].mxu1 %vm244_vm0, %v2359_v16 }
 0x10a   : > { %2178 = vmatpush3.bf16.msra.mxu1 %v2175_v51  ;;  %1978 = vmatprep.mubr.msk.f32.mxu1 %vm244_vm0, %v2364_v17 }
 0x10b   : > { %2180 = vmatprep.subr.bf16.mxu1 %v2179_v54 }
 0x10d   : > { %1979 = vmatmul.mubr.msk.f32.gmra.mrb[10].mxu1 %vm244_vm0, %v2374_v18 }
 0x10e   : > { %2182 = vmatpush3.bf16.msra.mxu1 %v2179_v54  ;;  %1981 = vmatprep.mubr.msk.f32.mxu1 %vm244_vm0, %v2380_v19 }
 0x10f   : > { %2184 = vmatprep.subr.bf16.mxu1 %v2183_v57 }
 0x111   : > { %1982 = vmatmul.mubr.msk.f32.gmra.mrb[12].mxu1 %vm244_vm0, %v2390_v20 }
 0x112   : > { %2186 = vmatpush3.bf16.msra.mxu1 %v2183_v57  ;;  %1984 = vmatprep.mubr.msk.f32.mxu1 %vm244_vm0, %v2395_v21 }
 0x113   : > { %2188 = vmatprep.subr.bf16.mxu1 %v2187_v60 }
 0x115   : > { %1985 = vmatmul.mubr.msk.f32.gmra.mrb[14].mxu1 %vm244_vm0, %v2404_v22 }
 0x116   : > { %2190 = vmatpush3.bf16.msra.mxu1 %v2187_v60  ;;  %2019 = vmatprep.mubr.msk.f32.mxu1 %vm244_vm0, %v2310_v0 }
 0x117   : > { %2196 = vmatprep.subr.bf16.mxu1 %v2413_v28 }
 0x119   : > { %2020 = vmatmul.mubr.msk.f32.vlgmr.msra.gmra.mrb[16].mxu1 %vm244_vm0, %v2359_v16 }
 0x11a   : > { %2198 = vmatpush3.bf16.msra.mxu1 %v2413_v28  ;;  %2022 = vmatprep.mubr.msk.f32.mxu1 %vm244_vm0, %v2364_v17 }
 0x11b   : > { %2200 = vmatprep.subr.bf16.mxu1 %v2199_v63 }
 0x11d   : > { %2023 = vmatmul.mubr.msk.f32.gmra.mrb[18].mxu1 %vm244_vm0, %v2374_v18 }
 0x11e   : > { %2202 = vmatpush3.bf16.msra.mxu1 %v2199_v63  ;;  %2025 = vmatprep.mubr.msk.f32.mxu1 %vm244_vm0, %v2380_v19 }
 0x11f   : > { %2204 = vmatprep.subr.bf16.mxu1 %v2203_v4 }
 0x121   : > { %2026 = vmatmul.mubr.msk.f32.gmra.mrb[20].mxu1 %vm244_vm0, %v2390_v20 }
 0x122   : > { %2206 = vmatpush3.bf16.msra.mxu1 %v2203_v4  ;;  %2028 = vmatprep.mubr.msk.f32.mxu1 %vm244_vm0, %v2395_v21 }
 0x123   : > { %2208 = vmatprep.subr.bf16.mxu1 %v2207_v9 }
 0x125   : > { %2029 = vmatmul.mubr.msk.f32.gmra.mrb[22].mxu1 %vm244_vm0, %v2404_v22 }
 0x126   : > { %2210 = vmatpush3.bf16.msra.mxu1 %v2207_v9  ;;  %2063 = vmatprep.mubr.msk.f32.mxu1 %vm244_vm0, %v2310_v0 }
 0x127   : > { %2216 = vmatprep.subr.bf16.mxu1 %v2417_v31 }
 0x129   : > { %2064 = vmatmul.mubr.msk.f32.vlgmr.msra.gmra.mrb[24].mxu1 %vm244_vm0, %v2359_v16 }
 0x12a   : > { %2218 = vmatpush3.bf16.msra.mxu1 %v2417_v31  ;;  %2066 = vmatprep.mubr.msk.f32.mxu1 %vm244_vm0, %v2364_v17 }
 0x12b   : > { %2220 = vmatprep.subr.bf16.mxu1 %v2219_v23 }
 0x12d   : > { %2067 = vmatmul.mubr.msk.f32.gmra.mrb[26].mxu1 %vm244_vm0, %v2374_v18 }
 0x12e   : > { %2222 = vmatpush3.bf16.msra.mxu1 %v2219_v23  ;;  %2069 = vmatprep.mubr.msk.f32.mxu1 %vm244_vm0, %v2380_v19 }
 0x12f   : > { %2224 = vmatprep.subr.bf16.mxu1 %v2223_v6 }
 0x131   : > { %2070 = vmatmul.mubr.msk.f32.gmra.mrb[28].mxu1 %vm244_vm0, %v2390_v20 }
 0x132   : > { %2226 = vmatpush3.bf16.msra.mxu1 %v2223_v6  ;;  %2072 = vmatprep.mubr.msk.f32.mxu1 %vm244_vm0, %v2395_v21 }
 0x133   : > { %2228 = vmatprep.subr.bf16.mxu1 %v2227_v10 }
 0x135   : > { %2073 = vmatmul.mubr.msk.f32.gmra.mrb[30].mxu1 %vm244_vm0, %v2404_v22 }
 0x136   : > { %2230 = vmatpush3.bf16.msra.mxu1 %v2227_v10  ;;  %2107 = vmatprep.mubr.msk.f32.mxu1 %vm244_vm0, %v2310_v0 }
 0x137   : > { %2235 = vmatprep.subr.bf16.mxu1 %v2322_v3 }
 0x139   : > { %2108 = vmatmul.mubr.msk.f32.vlgmr.msra.gmra.mrb[32].mxu1 %vm244_vm0, %v2359_v16 }
 0x13a   : > { %2110 = vmatprep.mubr.msk.f32.mxu1 %vm244_vm0, %v2364_v17  ;;  %2236 = vmatpush3.bf16.msra.mxu1 %v2322_v3 }
 0x13d   : > { %2111 = vmatmul.mubr.msk.f32.gmra.mrb[34].mxu1 %vm244_vm0, %v2374_v18 }
 0x13e   : > { %2113 = vmatprep.mubr.msk.f32.mxu1 %vm244_vm0, %v2380_v19 }
 0x141   : > { %2114 = vmatmul.mubr.msk.f32.gmra.mrb[36].mxu1 %vm244_vm0, %v2390_v20 }
 0x142   : > { %2116 = vmatprep.mubr.msk.f32.mxu1 %vm244_vm0, %v2395_v21 }
 0x145   : > { %2117 = vmatmul.mubr.msk.f32.gmra.mrb[38].mxu1 %vm244_vm0, %v2404_v22 }
 0x1cc   : > { %v2555_v0 = vpop.f32.mrb[0].mxu1 }
 0x1cd   : > { %v2557_v11 = vpop.f32.mrb[1].mxu1  ;;  %v1465_v56 = vmul.f32 %v2555_v0, %v2555_v0 }
 0x1ce   : > { %v1464_v60 = vmul.f32 %v2557_v11, %v2557_v11 }
 0x1d0   : > { %v2559_v13 = vpop.f32.mrb[2].mxu1 }
 0x1d1   : > { %v2561_v14 = vpop.f32.mrb[3].mxu1  ;;  %v1467_v4 = vmul.f32 %v2559_v13, %v2559_v13 }
 0x1d2   : > { %v1466_v12 = vmul.f32 %v2561_v14, %v2561_v14 }
 0x1d4   : > { %v2563_v16 = vpop.f32.mrb[4].mxu1 }
 0x1d5   : > { %v2565_v17 = vpop.f32.mrb[5].mxu1  ;;  %v2630_v8 = vmul.f32 %v2563_v16, %v2563_v16 }
 0x1d8   : > { %v2567_v18 = vpop.f32.mrb[6].mxu1 }
 0x1d9   : > { %v2569_v19 = vpop.f32.mrb[7].mxu1 }
 0x1dc   : > { %v1977_v20 = vpop.f32.mrb[8].mxu1 }
 0x1dd   : > { %v570_v21 = vpop.f32.mrb[9].mxu1 }
 0x1de   : > { %1991 = vmatprep.mubr.msk.f32.mxu0 %vm374_vm1, %v570_v21 }
 0x1df   : > { %1992 = vmatmul.mubr.msk.f32.vlgmr.msra.gmra.mrb[8].mxu0 %vm374_vm1, %v1977_v20 }
 0x1e0   : > { %2194 = vmatpush3.bf16.msra.mxu0 %v2322_v3  ;;  %v1980_v22 = vpop.f32.mrb[10].mxu1 }
 0x1e1   : > { %v580_v27 = vpop.f32.mrb[11].mxu1  ;;  %2212 = vmatprep.subr.bf16.mxu0 %v2322_v3 }
 0x1e2   : > { %1994 = vmatprep.mubr.msk.f32.mxu0 %vm374_vm1, %v580_v27  ;;  %v2643_v27 = vmul.f32 %v2567_v18, %v2567_v18 }
 0x1e3   : > { %1995 = vmatmul.mubr.msk.f32.gmra.mrb[10].mxu0 %vm374_vm1, %v1980_v22 }
 0x1e4   : > { %v1983_v28 = vpop.f32.mrb[12].mxu1 }
 0x1e5   : > { %v590_v29 = vpop.f32.mrb[13].mxu1 }
 0x1e6   : > { %1997 = vmatprep.mubr.msk.f32.mxu0 %vm374_vm1, %v590_v29 }
 0x1e7   : > { %1998 = vmatmul.mubr.msk.f32.gmra.mrb[12].mxu0 %vm374_vm1, %v1983_v28 }
 0x1e8   : > { %v1986_v30 = vpop.f32.mrb[14].mxu1 }
 0x1e9   : > { %v600_v31 = vpop.f32.mrb[15].mxu1 }
 0x1ea   : > { %2000 = vmatprep.mubr.msk.f32.mxu0 %vm374_vm1, %v600_v31 }
 0x1eb   : > { %2001 = vmatmul.mubr.msk.f32.gmra.mrb[14].mxu0 %vm374_vm1, %v1986_v30  ;;  %v2652_v30 = vmul.f32 %v2569_v19, %v2569_v19 }
 0x1ec   : > { %v2021_v32 = vpop.f32.mrb[16].mxu1 }
 0x1ed   : > { %v812_v33 = vpop.f32.mrb[17].mxu1 }
 0x1ee   : > { %2035 = vmatprep.mubr.msk.f32.mxu0 %vm374_vm1, %v812_v33 }
 0x1ef   : > { %2036 = vmatmul.mubr.msk.f32.vlgmr.msra.gmra.mrb[16].mxu0 %vm374_vm1, %v2021_v32 }
 0x1f0   : > { %2214 = vmatpush3.bf16.msra.mxu0 %v2322_v3  ;;  %v2024_v34 = vpop.f32.mrb[18].mxu1 }
 0x1f1   : > { %v822_v35 = vpop.f32.mrb[19].mxu1  ;;  %2232 = vmatprep.subr.bf16.mxu0 %v2322_v3 }
 0x1f2   : > { %2038 = vmatprep.mubr.msk.f32.mxu0 %vm374_vm1, %v822_v35 }
 0x1f3   : > { %2039 = vmatmul.mubr.msk.f32.gmra.mrb[18].mxu0 %vm374_vm1, %v2024_v34 }
 0x1f4   : > { %v2027_v36 = vpop.f32.mrb[20].mxu1 }
 0x1f5   : > { %v832_v37 = vpop.f32.mrb[21].mxu1 }
 0x1f6   : > { %2041 = vmatprep.mubr.msk.f32.mxu0 %vm374_vm1, %v832_v37 }
 0x1f7   : > { %2042 = vmatmul.mubr.msk.f32.gmra.mrb[20].mxu0 %vm374_vm1, %v2027_v36 }
 0x1f8   : > { %v2030_v38 = vpop.f32.mrb[22].mxu1 }
 0x1f9   : > { %v842_v39 = vpop.f32.mrb[23].mxu1 }
 0x1fa   : > { %2044 = vmatprep.mubr.msk.f32.mxu0 %vm374_vm1, %v842_v39 }
 0x1fb   : > { %2045 = vmatmul.mubr.msk.f32.gmra.mrb[22].mxu0 %vm374_vm1, %v2030_v38 }
 0x1fc   : > { %v2065_v40 = vpop.f32.mrb[24].mxu1 }
 0x1fd   : > { %v1054_v41 = vpop.f32.mrb[25].mxu1 }
 0x1fe   : > { %2079 = vmatprep.mubr.msk.f32.mxu0 %vm374_vm1, %v1054_v41 }
 0x1ff   : > { %2080 = vmatmul.mubr.msk.f32.vlgmr.msra.gmra.mrb[24].mxu0 %vm374_vm1, %v2065_v40 }
 0x200   : > { %2234 = vmatpush3.bf16.msra.mxu0 %v2322_v3  ;;  %v2068_v42 = vpop.f32.mrb[26].mxu1 }
 0x201   : > { %v1064_v43 = vpop.f32.mrb[27].mxu1 }
 0x202   : > { %2082 = vmatprep.mubr.msk.f32.mxu0 %vm374_vm1, %v1064_v43 }
 0x203   : > { %2083 = vmatmul.mubr.msk.f32.gmra.mrb[26].mxu0 %vm374_vm1, %v2068_v42 }
 0x204   : > { %v2071_v44 = vpop.f32.mrb[28].mxu1 }
 0x205   : > { %v1074_v45 = vpop.f32.mrb[29].mxu1 }
 0x206   : > { %2085 = vmatprep.mubr.msk.f32.mxu0 %vm374_vm1, %v1074_v45 }
 0x207   : > { %2086 = vmatmul.mubr.msk.f32.gmra.mrb[28].mxu0 %vm374_vm1, %v2071_v44 }
 0x208   : > { %v2074_v46 = vpop.f32.mrb[30].mxu1 }
 0x209   : > { %v1084_v47 = vpop.f32.mrb[31].mxu1 }
 0x20a   : > { %2088 = vmatprep.mubr.msk.f32.mxu0 %vm374_vm1, %v1084_v47 }
 0x20b   : > { %2089 = vmatmul.mubr.msk.f32.gmra.mrb[30].mxu0 %vm374_vm1, %v2074_v46 }
 0x20c   : > { %v2109_v48 = vpop.f32.mrb[32].mxu1 }
 0x20d   : > { %v1296_v3 = vpop.f32.mrb[33].mxu1 }
 0x20e   : > { %2123 = vmatprep.mubr.msk.f32.mxu0 %vm374_vm1, %v1296_v3 }
 0x20f   : > { %2124 = vmatmul.mubr.msk.f32.vlgmr.msra.gmra.mrb[32].mxu0 %vm374_vm1, %v2109_v48 }
 0x210   : > { %v2112_v49 = vpop.f32.mrb[34].mxu1 }
 0x211   : > { %v1306_v50 = vpop.f32.mrb[35].mxu1 }
 0x212   : > { %2126 = vmatprep.mubr.msk.f32.mxu0 %vm374_vm1, %v1306_v50 }
 0x213   : > { %2127 = vmatmul.mubr.msk.f32.gmra.mrb[34].mxu0 %vm374_vm1, %v2112_v49 }
 0x214   : > { %v2115_v51 = vpop.f32.mrb[36].mxu1 }
 0x215   : > { %v1316_v52 = vpop.f32.mrb[37].mxu1 }
 0x216   : > { %2129 = vmatprep.mubr.msk.f32.mxu0 %vm374_vm1, %v1316_v52 }
 0x217   : > { %2130 = vmatmul.mubr.msk.f32.gmra.mrb[36].mxu0 %vm374_vm1, %v2115_v51 }
 0x218   : > { %v2118_v53 = vpop.f32.mrb[38].mxu1 }
 0x219   : > { %v1326_v54 = vpop.f32.mrb[39].mxu1 }
 0x21a   : > { %2132 = vmatprep.mubr.msk.f32.mxu1 %vm374_vm1, %v1326_v54 }
 0x21b   : > { %2133 = vmatmul.mubr.msk.f32.vlgmr.msra.gmra.mrb[40].mxu1 %vm374_vm1, %v2118_v53 }
 0x2b2   : > { %v1993_v55 = vpop.f32.mrb[8].mxu0 }
 0x2b3   : > { %v1473_v57 = vmul.f32 %v1993_v55, %v1993_v55  ;;  %v2611_v58 = vmul.f32 %v1993_v55, %v2555_v0  ;;  %v699_v59 = vpop.f32.mrb[9].mxu0 }
 0x2b4   : > { %v1472_v61 = vmul.f32 %v699_v59, %v699_v59  ;;  %v2616_v62 = vmul.f32 %v699_v59, %v2557_v11  ;;  %v1468_v11 = vmul.f32 %v2565_v17, %v2565_v17 }
 0x2b5   : > { %v1553_v63 = vadd.f32 %v1473_v57, %v1465_v56 }
 0x2b6   : > { %v1552_v1 = vadd.f32 %v1472_v61, %v1464_v60  ;;  %v1996_v2 = vpop.f32.mrb[10].mxu0 }
 0x2b7   : > { %v1475_v5 = vmul.f32 %v1996_v2, %v1996_v2  ;;  %v2621_v7 = vmul.f32 %v1996_v2, %v2559_v13  ;;  %v709_v9 = vpop.f32.mrb[11].mxu0  ;;  %v1561_v54 = vadd.f32 0.0001, %v1553_v63 }
 0x2b8   : > { %v1474_v15 = vmul.f32 %v709_v9, %v709_v9  ;;  %v2626_v23 = vmul.f32 %v709_v9, %v2561_v14 }
 0x2b9   : > { %v1555_v24 = vadd.f32 %v1475_v5, %v1467_v4 }
 0x2ba   : > { %v1554_v25 = vadd.f32 %v1474_v15, %v1466_v12  ;;  %v1999_v6 = vpop.f32.mrb[12].mxu0 }
 0x2bb   : > { %v1477_v26 = vmul.f32 %v1999_v6, %v1999_v6  ;;  %v2633_v10 = vmul.f32 %v1999_v6, %v2563_v16  ;;  %v719_v0 = vpop.f32.mrb[13].mxu0 }
 0x2bc   : > { %v1476_v13 = vmul.f32 %v719_v0, %v719_v0  ;;  %v2638_v20 = vmul.f32 %v719_v0, %v2565_v17 }
 0x2bd   : > { %v1557_v14 = vadd.f32 %v1477_v26, %v2630_v8 }
 0x2be   : > { %v1556_v21 = vadd.f32 %v1476_v13, %v1468_v11  ;;  %v2002_v22 = vpop.f32.mrb[14].mxu0 }
 0x2bf   : > { %v2645_v28 = vmul.f32 %v2002_v22, %v2002_v22  ;;  %v2648_v16 = vmul.f32 %v2002_v22, %v2567_v18  ;;  %v729_v29 = vpop.f32.mrb[15].mxu0 }
 0x2c0   : > { %v2654_v17 = vmul.f32 %v729_v29, %v729_v29  ;;  %v2657_v31 = vmul.f32 %v729_v29, %v2569_v19 }
 0x2c1   : > { %v2661_v32 = vadd.f32 %v2645_v28, %v2643_v27 }
 0x2c2   : > { %v2665_v33 = vadd.f32 %v2654_v17, %v2652_v30  ;;  %v2037_v18 = vpop.f32.mrb[16].mxu0 }
 0x2c3   : > { %v1489_v34 = vsub.f32 %v2037_v18, %v1465_v56  ;;  %v941_v35 = vpop.f32.mrb[17].mxu0 }
 0x2c4   : > { %v1488_v36 = vsub.f32 %v941_v35, %v1464_v60  ;;  %v1560_v60 = vadd.f32 0.0001, %v1552_v1  ;;  %v1565_v1 = vadd.f32 0.0001, %v1557_v14  ;;  %v1567_v14 = vadd.f32 0.0001, %v2661_v32 }
 0x2c6   : > { %v2040_v37 = vpop.f32.mrb[18].mxu0 }
 0x2c7   : > { %v1491_v38 = vsub.f32 %v2040_v37, %v1467_v4  ;;  %v951_v39 = vpop.f32.mrb[19].mxu0 }
 0x2c8   : > { %v1490_v40 = vsub.f32 %v951_v39, %v1466_v12 }
 0x2ca   : > { %v2043_v41 = vpop.f32.mrb[20].mxu0 }
 0x2cb   : > { %v1493_v19 = vsub.f32 %v2043_v41, %v2630_v8  ;;  %v961_v42 = vpop.f32.mrb[21].mxu0 }
 0x2cc   : > { %v1492_v43 = vsub.f32 %v961_v42, %v1468_v11  ;;  %v1563_v11 = vadd.f32 0.0001, %v1555_v24  ;;  %v1512_v42 = vmul.f32 2.0, %v2616_v62 }
 0x2ce   : > { %v2046_v44 = vpop.f32.mrb[22].mxu0 }
 0x2cf   : > { %v1495_v45 = vsub.f32 %v2046_v44, %v2643_v27  ;;  %v971_v46 = vpop.f32.mrb[23].mxu0  ;;  %v1566_v44 = vadd.f32 0.0001, %v2665_v33 }
 0x2d0   : > { %v1494_v47 = vsub.f32 %v971_v46, %v2652_v30 }
 0x2d2   : > { %v2081_v48 = vpop.f32.mrb[24].mxu0 }
 0x2d3   : > { %v1497_v3 = vsub.f32 %v2081_v48, %v1473_v57  ;;  %v1183_v49 = vpop.f32.mrb[25].mxu0 }
 0x2d4   : > { %v1496_v50 = vsub.f32 %v1183_v49, %v1472_v61  ;;  %v1562_v61 = vadd.f32 0.0001, %v1554_v25  ;;  %v1517_v49 = vmul.f32 2.0, %v2633_v10 }
 0x2d5   : > { %v1569_v51 = vadd.f32 %v1497_v3, %v1489_v34  ;;  %v1514_v3 = vmul.f32 2.0, %v2626_v23 }
 0x2d6   : > { %v1568_v52 = vadd.f32 %v1496_v50, %v1488_v36  ;;  %v2084_v53 = vpop.f32.mrb[26].mxu0 }
 0x2d7   : > { %v1577_v55 = vadd.f32 0.0009, %v1569_v51  ;;  %v1499_v56 = vsub.f32 %v2084_v53, %v1475_v5  ;;  %v1193_v59 = vpop.f32.mrb[27].mxu0 }
 0x2d8   : > { %v1576_v2 = vadd.f32 0.0009, %v1568_v52  ;;  %v1498_v4 = vsub.f32 %v1193_v59, %v1474_v15  ;;  %v1516_v52 = vmul.f32 2.0, %v2638_v20 }
 0x2d9   : > { %v1585_v9 = vmul.f32 %v1577_v55, %v1561_v54  ;;  %v1571_v12 = vadd.f32 %v1499_v56, %v1491_v38  ;;  %v1564_v38 = vadd.f32 0.0001, %v1556_v21 }
 0x2da   : > { %v1584_v6 = vmul.f32 %v1576_v2, %v1560_v60  ;;  %v1570_v8 = vadd.f32 %v1498_v4, %v1490_v40  ;;  %v2087_v0 = vpop.f32.mrb[28].mxu0 }
 0x2db   : > { %v1579_v22 = vadd.f32 0.0009, %v1571_v12  ;;  %v1501_v57 = vsub.f32 %v2087_v0, %v1477_v26  ;;  %v1203_v27 = vpop.f32.mrb[29].mxu0  ;;  %2247 = vrcp.f32 %v1585_v9  ;;  %v1522_v9 = vadd.f32 0.0001, %v1514_v3 }
 0x2dc   : > { %v1578_v29 = vadd.f32 0.0009, %v1570_v8  ;;  %v1500_v30 = vsub.f32 %v1203_v27, %v1476_v13  ;;  %2249 = vrcp.f32 %v1584_v6  ;;  %v1513_v13 = vmul.f32 2.0, %v2611_v58 }
 0x2dd   : > { %v1587_v18 = vmul.f32 %v1579_v22, %v1563_v11  ;;  %v1573_v63 = vadd.f32 %v1501_v57, %v1493_v19  ;;  %v1525_v12 = vadd.f32 0.0001, %v1517_v49  ;;  %v1524_v22 = vadd.f32 0.0001, %v1516_v52 }
 0x2de   : > { %v1586_v34 = vmul.f32 %v1578_v29, %v1562_v61  ;;  %v1572_v5 = vadd.f32 %v1500_v30, %v1492_v43  ;;  %v2090_v35 = vpop.f32.mrb[30].mxu0 }
 0x2df   : > { %v1581_v36 = vadd.f32 0.0009, %v1573_v63  ;;  %v1503_v15 = vsub.f32 %v2090_v35, %v2645_v28  ;;  %v1213_v37 = vpop.f32.mrb[31].mxu0  ;;  %2251 = vrcp.f32 %v1587_v18  ;;  %v1519_v35 = vmul.f32 2.0, %v2648_v16 }
 0x2e0   : > { %v1580_v39 = vadd.f32 0.0009, %v1572_v5  ;;  %v1502_v24 = vsub.f32 %v1213_v37, %v2654_v17  ;;  %2253 = vrcp.f32 %v1586_v34 }
 0x2e1   : > { %v1589_v26 = vmul.f32 %v1581_v36, %v1565_v1  ;;  %v1575_v25 = vadd.f32 %v1503_v15, %v1495_v45  ;;  %v1515_v45 = vmul.f32 2.0, %v2621_v7 }
 0x2e2   : > { %v1588_v40 = vmul.f32 %v1580_v39, %v1564_v38  ;;  %v1574_v41 = vadd.f32 %v1502_v24, %v1494_v47  ;;  %v2125_v19 = vpop.f32.mrb[32].mxu0 }
 0x2e3   : > { %v1583_v43 = vadd.f32 0.0009, %v1575_v25  ;;  %v1505_v28 = vsub.f32 %v2125_v19, %v2611_v58  ;;  %v1425_v21 = vpop.f32.mrb[33].mxu0  ;;  %v1521_v58 = vadd.f32 0.0001, %v1513_v13  ;;  %2255 = vrcp.f32 %v1589_v26 }
 0x2e4   : > { %v1582_v17 = vadd.f32 0.0009, %v1574_v41  ;;  %v1504_v46 = vsub.f32 %v1425_v21, %v2616_v62  ;;  %v1520_v62 = vadd.f32 0.0001, %v1512_v42  ;;  %v1523_v59 = vadd.f32 0.0001, %v1515_v45 }
 0x2e5   : > { %v1591_v48 = vmul.f32 %v1583_v43, %v1567_v14  ;;  %v1529_v47 = vmul.f32 2.0, %v1505_v28  ;;  %2257 = vrcp.f32 %v1588_v40  ;;  %v2248_v4 = vpop.eup %2247  ;;  %v1518_v25 = vmul.f32 2.0, %v2657_v31 }
 0x2e6   : > { %v1590_v32 = vmul.f32 %v1582_v17, %v1566_v44  ;;  %v1528_v50 = vmul.f32 2.0, %v1504_v46  ;;  %v2128_v51 = vpop.f32.mrb[34].mxu0  ;;  %v2250_v11 = vpop.eup %2249  ;;  %v1527_v17 = vadd.f32 0.0001, %v1519_v35 }
 0x2e7   : > { %v1537_v33 = vadd.f32 0.0009, %v1529_v47  ;;  %v1507_v53 = vsub.f32 %v2128_v51, %v2621_v7  ;;  %v1435_v54 = vpop.f32.mrb[35].mxu0  ;;  %2259 = vrcp.f32 %v1591_v48 }
 0x2e8   : > { %v1536_v55 = vadd.f32 0.0009, %v1528_v50  ;;  %v1506_v56 = vsub.f32 %v1435_v54, %v2626_v23  ;;  %2261 = vrcp.f32 %v1590_v32 }
 0x2e9   : > { %v1545_v60 = vmul.f32 %v1537_v33, %v1521_v58  ;;  %v1531_v2 = vmul.f32 2.0, %v1507_v53  ;;  %v2252_v5 = vpop.eup %2251 }
 0x2ea   : > { %v1544_v6 = vmul.f32 %v1536_v55, %v1520_v62  ;;  %v1530_v8 = vmul.f32 2.0, %v1506_v56  ;;  %v2131_v0 = vpop.f32.mrb[36].mxu0 }
 0x2eb   : > { %v1601_v57 = vmul.f32 %v2248_v4, %v1545_v60  ;;  %v1539_v7 = vadd.f32 0.0009, %v1531_v2  ;;  %v1509_v27 = vsub.f32 %v2131_v0, %v2633_v10  ;;  %v1445_v61 = vpop.f32.mrb[37].mxu0  ;;  %v2254_v10 = vpop.eup %2253 }
 0x2ec   : > { %v1600_v29 = vmul.f32 %v2250_v11, %v1544_v6  ;;  %v1538_v23 = vadd.f32 0.0009, %v1530_v8  ;;  %v1508_v30 = vsub.f32 %v1445_v61, %v2638_v20 }
 0x2ed   : > { %v1609_v18 = vsel %vm374_vm1, %v1601_v57, 0.0  ;;  %v1547_v63 = vmul.f32 %v1539_v7, %v1523_v59  ;;  %v1533_v34 = vmul.f32 2.0, %v1509_v27  ;;  %v2256_v14 = vpop.eup %2255 }
 0x2ee   : > { %v1608_v1 = vsel %vm374_vm1, %v1600_v29, 0.0  ;;  %v1546_v36 = vmul.f32 %v1538_v23, %v1522_v9  ;;  %v1532_v15 = vmul.f32 2.0, %v1508_v30  ;;  %v2134_v37 = vpop.f32.mrb[40].mxu1 }
 0x2ef   : > { %v1610_v38 = vadd.f32 %v1609_v18, %v1608_v1  ;;  %v1603_v39 = vmul.f32 %v2252_v5, %v1547_v63  ;;  %v1541_v24 = vadd.f32 0.0009, %v1533_v34  ;;  %v1511_v26 = vsub.f32 %v2134_v37, %v2648_v16  ;;  %v1455_v20 = vpop.f32.mrb[41].mxu1  ;;  %v2258_v44 = vpop.eup %2257 }
 0x2f0   : > { %v1602_v13 = vmul.f32 %v2254_v10, %v1546_v36  ;;  %v1540_v40 = vadd.f32 0.0009, %v1532_v15  ;;  %v1510_v41 = vsub.f32 %v1455_v20, %v2657_v31  ;;  %v1526_v16 = vadd.f32 0.0001, %v1518_v25 }
 0x2f1   : > { %v1549_v19 = vmul.f32 %v1541_v24, %v1525_v12  ;;  %v1535_v42 = vmul.f32 2.0, %v1511_v26  ;;  %v1613_v47 = vsel %vm374_vm1, %v1603_v39, 0.0  ;;  %v2260_v31 = vpop.eup %2259 }
 0x2f2   : > { %v1611_v43 = vsel %vm374_vm1, %v1602_v13, 0.0  ;;  %v1548_v28 = vmul.f32 %v1540_v40, %v1524_v22  ;;  %v1534_v21 = vmul.f32 2.0, %v1510_v41  ;;  %v2262_v52 = vpop.eup %2261 }
 0x2f3   : > { %v1612_v46 = vadd.f32 %v1611_v43, %v1610_v38  ;;  %v1605_v45 = vmul.f32 %v2256_v14, %v1549_v19  ;;  %v1543_v48 = vadd.f32 0.0009, %v1535_v42 }
 0x2f4   : > { %v1604_v3 = vmul.f32 %v2258_v44, %v1548_v28  ;;  %v1542_v49 = vadd.f32 0.0009, %v1534_v21 }
 0x2f5   : > { %v1551_v32 = vmul.f32 %v1543_v48, %v1527_v17  ;;  %v1614_v50 = vadd.f32 %v1613_v47, %v1612_v46  ;;  %v1617_v62 = vsel %vm374_vm1, %v1605_v45, 0.0 }
 0x2f6   : > { %v1550_v51 = vmul.f32 %v1542_v49, %v1526_v16  ;;  %v1615_v58 = vsel %vm374_vm1, %v1604_v3, 0.0 }
 0x2f7   : > { %v1607_v33 = vmul.f32 %v2260_v31, %v1551_v32  ;;  %v1616_v53 = vadd.f32 %v1615_v58, %v1614_v50 }
 0x2f8   : > { %v1606_v54 = vmul.f32 %v2262_v52, %v1550_v51 }
 0x2f9   : > { %v1618_v55 = vadd.f32 %v1617_v62, %v1616_v53  ;;  %v1621_v60 = vsel %vm374_vm1, %v1607_v33, 0.0 }
 0x2fa   : > { %v1619_v56 = vsel %vm374_vm1, %v1606_v54, 0.0 }
 0x2fb   : > { %v1620_v59 = vadd.f32 %v1619_v56, %v1618_v55 }
 0x2fd   : > { %v1622_v2 = vadd.f32 %v1621_v60, %v1620_v59 }
 0x2ff   : > { %1623 = vadd.xlane.f32.xlu0 %v1622_v2 }
 0x38c   : > { %v1624_v4 = vpop.xlane.xlu0 %1623 }
 0x38d   : > { %v1625_v9 = vrot.slane %v1624_v4, 4 }
 0x38f   : > { %v1626_v12 = vadd.f32 %v1625_v9, %v1624_v4 }
 0x391   : > { %v1627_v6 = vrot.slane %v1626_v12, 2 }
 0x393   : > { %v1628_v8 = vadd.f32 %v1627_v6, %v1626_v12 }
 0x395   : > { %v1629_v0 = vrot.slane %v1628_v8, 1 }
 0x397   : > { %v1630_v11 = vadd.f32 %v1629_v0, %v1628_v8 }
 0x399   : > { %2237 = vpush %v1630_v11 }
 0x3ca   : > { %s2238_s24 = spop %2237 }
 0x3cb   : > { %v1632_v22 = vstv %s2238_s24 }
 0x3cc   : > { %1634 = vst.msk [vmem:[%s217_s23] sm:$0x1] %vm1633_vm2, %v1632_v22 }
 0x3cd PF: > { %s14_s15 = sadd.s32 1, %s2269_s15  }
 0x3ce   : > { %p11_p5 = scmp.ge.s32.totalorder %s14_s15, 4  }
 0x3d0   :  { %13 = sbr.rel (!%p11_p5) target bundleno = 1 (0x1), region = 69 }

</bundles_post_ra>
